<compile_context>
chip_gen: v7x
topology: tpu7x:2x2x1
jax: 0.10.0
libtpu: 0.0.40
codegen_flags: <defaults>
</compile_context>

<pallas_src>
import functools

import jax
import jax.numpy as jnp
from jax.experimental import pallas as pl
from jax.experimental.pallas import tpu as pltpu

LANE = 128
BN_EPS = 1e-5


# ---------------- small helpers ----------------

def _round_up(x, m):
    return (x + m - 1) // m * m


def _pick_tile(dim, candidates):
    for c in candidates:
        if c <= dim and dim % c == 0:
            return c
    return dim


@functools.lru_cache(maxsize=None)
def _vmem_budget():
    """Per-generation VMEM budget: ~75% of per-core capacity (96 MiB v5e/v6e, 48 MiB v7x)."""
    try:
        cap = int(pltpu.get_tpu_info().vmem_capacity_bytes)
    except Exception:
        cap = 64 * 1024 * 1024
    return (cap * 3) // 4


# ---------------- Pallas kernels ----------------

def _linear_bn_relu_resident_kernel(x_ref, w_ref, gamma_ref, beta_ref, o_ref):
    # grid = (N_tiles,).  x: (B, Kp) bf16, resident across the whole grid (constant
    # index_map -> DMA'd once).  w: (Kp, tn) bf16.  gamma/beta: (1, tn) f32.
    # o: (B, tn) bf16.  Full-K dot per N tile, BN(batch stats)+ReLU in the epilogue.
    h = jnp.dot(x_ref[...], w_ref[...], preferred_element_type=jnp.float32)
    inv_b = 1.0 / h.shape[0]
    mean = jnp.sum(h, axis=0, keepdims=True) * inv_b
    c = h - mean
    var = jnp.sum(c * c, axis=0, keepdims=True) * inv_b      # biased, two-pass
    scale = gamma_ref[...] * jax.lax.rsqrt(var + BN_EPS)
    o_ref[...] = jnp.maximum(c * scale + beta_ref[...], 0.0).astype(o_ref.dtype)


def _linear_bn_relu_streaming_kernel(x_ref, w_ref, gamma_ref, beta_ref, o_ref, acc_ref):
    # Fallback when resident x does not fit VMEM.
    # grid = (N_tiles, K_tiles); K is the (innermost) reduction axis.
    k = pl.program_id(1)

    @pl.when(k == 0)
    def _():
        acc_ref[...] = jnp.zeros_like(acc_ref)

    acc_ref[...] += jnp.dot(x_ref[...], w_ref[...],
                            preferred_element_type=jnp.float32)

    @pl.when(k == pl.num_programs(1) - 1)
    def _():
        h = acc_ref[...]
        inv_b = 1.0 / h.shape[0]
        mean = jnp.sum(h, axis=0, keepdims=True) * inv_b
        c = h - mean
        var = jnp.sum(c * c, axis=0, keepdims=True) * inv_b
        scale = gamma_ref[...] * jax.lax.rsqrt(var + BN_EPS)
        o_ref[...] = jnp.maximum(c * scale + beta_ref[...], 0.0).astype(o_ref.dtype)


def _linear_l2norm_kernel(x_ref, w_ref, o_ref):
    # grid = (B_tiles,) ("parallel").  x: (tb, Kp) bf16.  w: (Kp, Np) bf16 resident.
    # o: (tb, Np) f32.  Padded output columns are zero (zero weight cols) so they do
    # not contribute to the row norm.
    z = jnp.dot(x_ref[...], w_ref[...], preferred_element_type=jnp.float32)
    ssq = jnp.sum(z * z, axis=1, keepdims=True)
    # F.normalize(z, dim=1) == z / max(||z||, 1e-12) == z * rsqrt(max(ssq, 1e-24))
    o_ref[...] = z * jax.lax.rsqrt(jnp.maximum(ssq, 1e-24))


# ---------------- wrappers (operate on pre-padded bf16 tensors) ----------------

def linear_bn_relu(h, w, gamma, beta):
    """relu(batchnorm1d(h @ w)) with batch statistics (PyTorch training mode).

    h: (B, Kp) bf16 (feature-padded).  w: (Kp, Np) bf16, zero-padded rows/cols.
    gamma/beta: (1, Np) f32, zero padding.  Returns (B, Np) bf16 with padded
    columns exactly zero.  The pre-BN Linear bias is omitted: BN's mean
    subtraction cancels it exactly in training mode.
    """
    B, Kp = h.shape
    Kp2, Np = w.shape
    assert Kp == Kp2 and gamma.shape == (1, Np) and beta.shape == (1, Np)
    budget = _vmem_budget()
    out_shape = jax.ShapeDtypeStruct((B, Np), jnp.bfloat16)

    tn = _pick_tile(Np, (512, 256, 128))

    # Resident-x plan cost estimate (bf16 x double-buffered by the pipeline, w/out tiles,
    # f32 matmul result + BN temporaries, Mosaic internal scratch headroom).
    resident_bytes = (2 * B * Kp * 2
                      + 2 * Kp * tn * 2
                      + 2 * B * tn * 2
                      + B * tn * 4
                      + (4 << 20))

    if resident_bytes <= budget:
        return pl.pallas_call(
            _linear_bn_relu_resident_kernel,
            out_shape=out_shape,
            grid_spec=pltpu.PrefetchScalarGridSpec(
                num_scalar_prefetch=0,
                grid=(Np // tn,),
                in_specs=[
                    pl.BlockSpec((B, Kp), lambda j: (0, 0)),     # x resident (1 DMA)
                    pl.BlockSpec((Kp, tn), lambda j: (0, j)),
                    pl.BlockSpec((1, tn), lambda j: (0, j)),
                    pl.BlockSpec((1, tn), lambda j: (0, j)),
                ],
                out_specs=pl.BlockSpec((B, tn), lambda j: (0, j)),
            ),
            compiler_params=pltpu.CompilerParams(
                dimension_semantics=("parallel",),
                vmem_limit_bytes=budget),
        )(h, w, gamma, beta)

    # Streaming fallback (e.g. very large B on v7x's 64 MiB/TC): N parallel,
    # K arbitrary innermost with f32 accumulator; 3-deep buffering on the big x tile.
    tk = _pick_tile(Kp, (1024, 512, 256, 128))
    return pl.pallas_call(
        _linear_bn_relu_streaming_kernel,
        out_shape=out_shape,
        grid_spec=pltpu.PrefetchScalarGridSpec(
            num_scalar_prefetch=0,
            grid=(Np // tn, Kp // tk),
            in_specs=[
                pl.BlockSpec((B, tk), lambda j, k: (0, k),
                             pipeline_mode=pl.Buffered(3)),
                pl.BlockSpec((tk, tn), lambda j, k: (k, j)),
                pl.BlockSpec((1, tn), lambda j, k: (0, j)),
                pl.BlockSpec((1, tn), lambda j, k: (0, j)),
            ],
            out_specs=pl.BlockSpec((B, tn), lambda j, k: (0, j)),
            scratch_shapes=[pltpu.VMEM((B, tn), jnp.float32)],
        ),
        compiler_params=pltpu.CompilerParams(
            dimension_semantics=("parallel", "arbitrary"),
            vmem_limit_bytes=budget),
    )(h, w, gamma, beta)


def linear_l2_normalize(h, w, *, tile_b=512):
    """L2-normalize(h @ w, dim=1): final bias-free Linear + F.normalize.

    h: (B, Kp) bf16 (feature-padded).  w: (Kp, Np) bf16 (zero-padded).
    Batch axis tiled and marked "parallel" (uses v7x's second TensorCore);
    the small final weight stays VMEM-resident.  Returns (B, Np) f32.
    """
    B, Kp = h.shape
    Kp2, Np = w.shape
    assert Kp == Kp2

    if B <= tile_b:
        tb, Bp = B, B
    else:
        tb = tile_b
        Bp = _round_up(B, tb)
        if Bp != B:
            h = jnp.pad(h, ((0, Bp - B), (0, 0)))   # zero rows -> zero (finite) outputs

    budget = _vmem_budget()
    out = pl.pallas_call(
        _linear_l2norm_kernel,
        out_shape=jax.ShapeDtypeStruct((Bp, Np), jnp.float32),
        grid_spec=pltpu.PrefetchScalarGridSpec(
            num_scalar_prefetch=0,
            grid=(Bp // tb,),
            in_specs=[
                pl.BlockSpec((tb, Kp), lambda b: (b, 0)),
                pl.BlockSpec((Kp, Np), lambda b: (0, 0)),       # weight resident
            ],
            out_specs=pl.BlockSpec((tb, Np), lambda b: (b, 0)),
        ),
        compiler_params=pltpu.CompilerParams(
            dimension_semantics=("parallel",),
            vmem_limit_bytes=budget),
    )(h, w)
    return out[:B] if Bp != B else out


# ---------------- parameters: init (raw f32) + one-time prepare (pad + bf16 cast) -----

def init_projection_params(key, input_dim, hidden_dim, output_dim, depth):
    # Pre-BN Linear bias is omitted: a no-op for the training-mode forward output,
    # since BatchNorm1d subtracts the per-feature batch mean.
    params = {"hidden": [], "final_w": None}
    d_in = input_dim
    for _ in range(depth):
        key, k_w = jax.random.split(key)
        bound = 1.0 / jnp.sqrt(d_in)
        w = jax.random.uniform(k_w, (d_in, hidden_dim), jnp.float32, -bound, bound)
        gamma = jnp.ones((hidden_dim,), jnp.float32)
        beta = jnp.zeros((hidden_dim,), jnp.float32)
        params["hidden"].append((w, gamma, beta))
        d_in = hidden_dim
    last_in = hidden_dim if depth > 0 else input_dim
    key, k_w = jax.random.split(key)
    bound = 1.0 / jnp.sqrt(last_in)
    params["final_w"] = jax.random.uniform(
        k_w, (last_in, output_dim), jnp.float32, -bound, bound)
    return params


def prepare_projection_params(params, input_dim):
    """One-time pad + bf16 cast of all weights (hoisted out of the per-call hot path)."""
    in_p = _round_up(max(input_dim, 1), LANE)
    hidden = []
    d_in_p = in_p
    for (w, gamma, beta) in params["hidden"]:
        k, n = w.shape
        n_p = _round_up(n, LANE)
        wp = jnp.zeros((d_in_p, n_p), jnp.bfloat16).at[:k, :n].set(w.astype(jnp.bfloat16))
        gp = jnp.zeros((1, n_p), jnp.float32).at[0, :n].set(gamma.astype(jnp.float32))
        bp = jnp.zeros((1, n_p), jnp.float32).at[0, :n].set(beta.astype(jnp.float32))
        hidden.append((wp, gp, bp))
        d_in_p = n_p
    kf, nf = params["final_w"].shape
    nf_p = _round_up(nf, LANE)
    fwp = jnp.zeros((d_in_p, nf_p), jnp.bfloat16).at[:kf, :nf].set(
        params["final_w"].astype(jnp.bfloat16))
    return {"hidden": hidden, "final_w": fwp,
            "input_dim": input_dim, "input_dim_p": in_p, "output_dim": nf}


def projection_forward(prep, x):
    B, K = x.shape
    assert K == prep["input_dim"]
    Kp = prep["input_dim_p"]
    h = x.astype(jnp.bfloat16)
    if Kp != K:
        h = jnp.pad(h, ((0, 0), (0, Kp - K)))        # only the first activation is padded
    for (w, g, b) in prep["hidden"]:
        h = linear_bn_relu(h, w, g, b)               # stays padded bf16 between layers
    out = linear_l2_normalize(h, prep["final_w"])    # padded f32
    n = prep["output_dim"]
    return out[:, :n] if out.shape[1] != n else out


# ---------------- pure-JAX reference (mirrors the kernel's bf16 cast points) ----------

def projection_ref(params, x):
    h = x.astype(jnp.float32)
    for (w, gamma, beta) in params["hidden"]:
        z = jnp.dot(h.astype(jnp.bfloat16), w.astype(jnp.bfloat16),
                    preferred_element_type=jnp.float32)
        mean = jnp.mean(z, axis=0, keepdims=True)
        c = z - mean
        var = jnp.mean(c * c, axis=0, keepdims=True)
        zn = c * (gamma * jax.lax.rsqrt(var + BN_EPS)) + beta
        h = jnp.maximum(zn, 0.0).astype(jnp.bfloat16).astype(jnp.float32)
    z = jnp.dot(h.astype(jnp.bfloat16), params["final_w"].astype(jnp.bfloat16),
                preferred_element_type=jnp.float32)
    n = jnp.sqrt(jnp.sum(z * z, axis=1, keepdims=True))
    return z / jnp.maximum(n, 1e-12)


if __name__ == "__main__":
    # Small shapes consistent with the module's (B, input_dim) input.
    B, INPUT_DIM, HIDDEN_DIM, OUTPUT_DIM, DEPTH = 8, 32, 32, 16, 1

    key = jax.random.PRNGKey(0)
    key, kx = jax.random.split(key)
    x = jax.random.normal(kx, (B, INPUT_DIM), jnp.float32)

    params = init_projection_params(key, INPUT_DIM, HIDDEN_DIM, OUTPUT_DIM, DEPTH)
    prep = prepare_projection_params(params, INPUT_DIM)

    out = jax.block_until_ready(projection_forward(prep, x))
    ref = projection_ref(params, x)

    assert out.shape == (B, OUTPUT_DIM)
    assert bool(jnp.all(jnp.isfinite(out)))
    assert jnp.allclose(out, ref, atol=2e-2, rtol=0), "mismatch vs reference"
    # rows must be unit-norm (F.normalize semantics)
    assert jnp.allclose(jnp.linalg.norm(out, axis=1), 1.0, atol=1e-3)

    print("KERNEL_OK")
</pallas_src>

<mosaic_0001>
module attributes {stable_mosaic.version = 11 : i64} {
  func.func @_linear_bn_relu_resident_kernel(%arg0: i32, %arg1: memref<8x128xbf16, #tpu.memory_space<vmem>>, %arg2: memref<128x128xbf16, #tpu.memory_space<vmem>>, %arg3: memref<1x128xf32, #tpu.memory_space<vmem>>, %arg4: memref<1x128xf32, #tpu.memory_space<vmem>>, %arg5: memref<8x128xbf16, #tpu.memory_space<vmem>>) attributes {dimension_semantics = [#tpu.dimension_semantics<parallel>], iteration_bounds = array<i64: 1>, scalar_prefetch = 0 : i64, scratch_operands = 0 : i64, tpu.core_type = #tpu.core_type<tc>, window_params = [{pipeline_mode = #tpu.pipeline_mode<synchronous>, transform_indices = @transform_0, window_bounds = array<i64: 8, 128>}, {transform_indices = @transform_1, window_bounds = array<i64: 128, 128>}, {transform_indices = @transform_2, window_bounds = array<i64: 1, 128>}, {transform_indices = @transform_3, window_bounds = array<i64: 1, 128>}, {transform_indices = @transform_4, window_bounds = array<i64: 8, 128>}]} {
    %c0 = arith.constant 0 : index
    %c0_0 = arith.constant 0 : index
    %0 = vector.load %arg1[%c0, %c0_0] : memref<8x128xbf16, #tpu.memory_space<vmem>>, vector<8x128xbf16>
    %c0_1 = arith.constant 0 : index
    %c0_2 = arith.constant 0 : index
    %1 = vector.load %arg2[%c0_1, %c0_2] : memref<128x128xbf16, #tpu.memory_space<vmem>>, vector<128x128xbf16>
    %cst = arith.constant dense<0.000000e+00> : vector<8x128xf32>
    %2 = tpu.matmul %0, %1, %cst {dimension_numbers = #tpu.dot_dimension_numbers<[1], [0], [0], [1], [0, 0, 1, 1], [], []>} : vector<8x128xbf16>, vector<128x128xbf16>, vector<8x128xf32> -> vector<8x128xf32>
    %cst_3 = arith.constant dense<0.000000e+00> : vector<128xf32>
    %3 = vector.multi_reduction <add>, %2, %cst_3 [0] : vector<8x128xf32> to vector<128xf32>
    %4 = vector.shape_cast %3 : vector<128xf32> to vector<1x128xf32>
    %cst_4 = arith.constant 1.250000e-01 : f32
    %5 = vector.broadcast %cst_4 : f32 to vector<1x128xf32>
    %6 = arith.mulf %4, %5 : vector<1x128xf32>
    %7 = vector.broadcast %6 : vector<1x128xf32> to vector<8x128xf32>
    %8 = arith.subf %2, %7 : vector<8x128xf32>
    %9 = arith.mulf %8, %8 : vector<8x128xf32>
    %cst_5 = arith.constant dense<0.000000e+00> : vector<128xf32>
    %10 = vector.multi_reduction <add>, %9, %cst_5 [0] : vector<8x128xf32> to vector<128xf32>
    %11 = vector.shape_cast %10 : vector<128xf32> to vector<1x128xf32>
    %cst_6 = arith.constant 1.250000e-01 : f32
    %12 = vector.broadcast %cst_6 : f32 to vector<1x128xf32>
    %13 = arith.mulf %11, %12 : vector<1x128xf32>
    %c0_7 = arith.constant 0 : index
    %c0_8 = arith.constant 0 : index
    %14 = vector.load %arg3[%c0_7, %c0_8] : memref<1x128xf32, #tpu.memory_space<vmem>>, vector<1x128xf32>
    %cst_9 = arith.constant 9.99999974E-6 : f32
    %15 = vector.broadcast %cst_9 : f32 to vector<1x128xf32>
    %16 = arith.addf %13, %15 : vector<1x128xf32>
    %17 = math.rsqrt %16 : vector<1x128xf32>
    %18 = arith.mulf %14, %17 : vector<1x128xf32>
    %19 = vector.broadcast %18 : vector<1x128xf32> to vector<8x128xf32>
    %20 = arith.mulf %8, %19 : vector<8x128xf32>
    %c0_10 = arith.constant 0 : index
    %c0_11 = arith.constant 0 : index
    %21 = vector.load %arg4[%c0_10, %c0_11] : memref<1x128xf32, #tpu.memory_space<vmem>>, vector<1x128xf32>
    %22 = vector.broadcast %21 : vector<1x128xf32> to vector<8x128xf32>
    %23 = arith.addf %20, %22 : vector<8x128xf32>
    %cst_12 = arith.constant 0.000000e+00 : f32
    %24 = vector.broadcast %cst_12 : f32 to vector<8x128xf32>
    %25 = arith.maximumf %23, %24 : vector<8x128xf32>
    %26 = arith.truncf %25 : vector<8x128xf32> to vector<8x128xbf16>
    %c0_13 = arith.constant 0 : index
    %c0_14 = arith.constant 0 : index
    %27 = vector.load %arg5[%c0_13, %c0_14] : memref<8x128xbf16, #tpu.memory_space<vmem>>, vector<8x128xbf16>
    tpu.vector_store %arg5[%c0_13, %c0_14], %26 {strides = array<i32>} : memref<8x128xbf16, #tpu.memory_space<vmem>>, vector<8x128xbf16>,
    return
  }
  func.func @transform_0(%arg0: i32) -> (i32, i32) {
    %c0_i32 = arith.constant 0 : i32
    %c0_i32_0 = arith.constant 0 : i32
    %c0_i32_1 = arith.constant 0 : i32
    return %c0_i32, %c0_i32_0 : i32, i32
  }
  func.func @transform_1(%arg0: i32) -> (i32, i32) {
    %c0_i32 = arith.constant 0 : i32
    %c0_i32_0 = arith.constant 0 : i32
    return %c0_i32, %arg0 : i32, i32
  }
  func.func @transform_2(%arg0: i32) -> (i32, i32) {
    %c0_i32 = arith.constant 0 : i32
    %c0_i32_0 = arith.constant 0 : i32
    return %c0_i32, %arg0 : i32, i32
  }
  func.func @transform_3(%arg0: i32) -> (i32, i32) {
    %c0_i32 = arith.constant 0 : i32
    %c0_i32_0 = arith.constant 0 : i32
    return %c0_i32, %arg0 : i32, i32
  }
  func.func @transform_4(%arg0: i32) -> (i32, i32) {
    %c0_i32 = arith.constant 0 : i32
    %c0_i32_0 = arith.constant 0 : i32
    return %c0_i32, %arg0 : i32, i32
  }
}

</mosaic_0001>

<bundles_post_ra>
// kernel: tpu_custom_call.1
= control target key start
LH: loop header
LB: loop body
LE: loop exit
PB: predicated region body
PF: predicated region fallthrough
CT: control target
= control target key end

     0   :  { %9 = vsyncpa [#allocation3], 0  ;;  %s412_s0 = inlined_call_operand.hbm [shape: bf16[8,128], index: 0, kind: input, shape index: {}]   ;;  %s413_s1 = inlined_call_operand.hbm [shape: bf16[128,128], index: 1, kind: input, shape index: {}]   ;;  %s414_s2 = inlined_call_operand.vmem [shape: f32[1,128], index: 2, kind: input, shape index: {}]   ;;  %s415_s3 = inlined_call_operand.vmem [shape: f32[1,128], index: 3, kind: input, shape index: {}]   ;;  %s416_s4 = inlined_call_operand.hbm [shape: bf16[8,128], index: 4, kind: output, shape index: {}]  }
   0x1   :  { %10 = vsyncpa [#allocation6], 0 }
   0x2   :  { %11 = vsyncpa [#allocation4], 0  ;;  %s331_s15 = smov [#allocation2]   ;;  %s332_s17 = smov [#allocation5]  }
   0x3   :  { %s18_s16 = sshll.u32 %s331_s15, 4  ;;  %s27_s18 = sshll.u32 %s332_s17, 4  ;;  %s19_s16 = int_to_ptr.vmem [resolvable:$true] %s18_s16  ;;  %s363_s18 = int_to_ptr.vmem [resolvable:$true] %s27_s18 }
   0x4   :  { %s259_s21 = scalar_lea.hbm %s412_s0, 64 }
   0x5   :  { %p260_p0 = scmp.ne.s32.totalorder %s412_s0, %s259_s21  ;;  %p263_p1 = scmp.lt.u32.totalorder %s259_s21, %s412_s0 }
   0x7   :  { %p265_p2 = pnand %p263_p1, %p260_p0 }
   0x9   :  { %268 = shalt.err (!%p265_p2)
}
   0xa   :  { %s269_s26 = scalar_lea.vmem %s19_s16, 64  ;;  %p274_p4 = scmp.lt.s32.totalorder %s19_s16, %s19_s16 }
   0xb   :  { %p270_p3 = scmp.ne.s32.totalorder %s19_s16, %s269_s26  ;;  %p275_p5 = scmp.lt.s32.totalorder %s269_s26, %s269_s26 }
   0xd   :  { %p276_p6 = por %p275_p5, %p274_p4 }
   0xf   :  { %p277_p7 = pnand %p276_p6, %p270_p3 }
  0x11   :  { %280 = shalt.err (!%p277_p7)
}
  0x12   :  { %21 = dma.hbm_to_vmem [thread:$0]  %s412_s0, 64, %s19_s16, [#allocation3]  }
  0x13   :  { %s281_s5 = scalar_lea.hbm %s413_s1, 1024 }
  0x14   :  { %p282_p8 = scmp.ne.s32.totalorder %s413_s1, %s281_s5  ;;  %p285_p9 = scmp.lt.u32.totalorder %s281_s5, %s413_s1 }
  0x16   :  { %p287_p10 = pnand %p285_p9, %p282_p8 }
  0x18   :  { %290 = shalt.err (!%p287_p10)
}
  0x19   :  { %s291_s10 = scalar_lea.vmem %s363_s18, 1024  ;;  %p296_p12 = scmp.lt.s32.totalorder %s363_s18, %s363_s18 }
  0x1a   :  { %p292_p11 = scmp.ne.s32.totalorder %s363_s18, %s291_s10  ;;  %p297_p13 = scmp.lt.s32.totalorder %s291_s10, %s291_s10 }
  0x1c   :  { %p298_p0 = por %p297_p13, %p296_p12 }
  0x1e   :  { %p299_p1 = pnand %p298_p0, %p292_p11 }
  0x20   :  { %302 = shalt.err (!%p299_p1)
}
  0x21   :  { %s333_s0 = smov 64   ;;  %s334_s11 = smov 4  }
  0x22   :  { %33 = dma.hbm_to_vmem [thread:$0]  %s413_s1, 1024, %s363_s18, [#allocation6], %s333_s0, %s333_s0, %s334_s11  }
  0x23   :  { %325 = dma.done.wait [#allocation3], 64  }
  0x24   :  { %326 = vsyncadd [#allocation3], 4294967232 }
  0x25   :  { %327 = dma.done.wait [#allocation6], 1024  }
  0x26   :  { %328 = vsyncadd [#allocation6], 4294966272  ;;  %v335_v0 = vmov 0.0   ;;  %vm336_vm0 = vmmov 0   ;;  %v249_v1 = vld [vmem:[#allocation5] sm:$0xff]   ;;  %v250_v2 = vld [vmem:[#allocation5 + $0x8] sm:$0xff]   ;;  %v171_v31 = vlaneseq }
  0x27   :  { %222 = vmatprep.subr.bf16.mxu0 %v335_v0  ;;  %238 = vmatprep.mubr.msk.bf16.mxu0 %vm336_vm0, %v335_v0  ;;  %v251_v3 = vld [vmem:[#allocation5 + $0x10] sm:$0xff]   ;;  %v252_v4 = vld [vmem:[#allocation5 + $0x18] sm:$0xff]   ;;  %v253_v5 = vld [vmem:[#allocation5 + $0x20] sm:$0xff]   ;;  %s337_s17 = smov [#allocation7]  }
  0x28   :  { %223 = vmatpush3.bf16.msra.mxu0 %v249_v1  ;;  %v254_v6 = vld [vmem:[#allocation5 + $0x28] sm:$0xff]   ;;  %v255_v7 = vld [vmem:[#allocation5 + $0x30] sm:$0xff]   ;;  %v256_v8 = vld [vmem:[#allocation5 + $0x38] sm:$0xff]   ;;  %v172_v32 = vshrl.u32 %v171_v31, 7  ;;  %s194_s18 = sshll.u32 %s337_s17, 4  ;;  %s195_s18 = int_to_ptr.vmem [resolvable:$true] %s194_s18 }
  0x29   :  { %224 = vmatprep.subr.bf16.mxu0 %v335_v0  ;;  %v45_v9 = vld [vmem:[#allocation2] sm:$0xf]  ;;  %s303_s19 = scalar_lea.vmem %s195_s18, 64  ;;  %p308_p3 = scmp.lt.s32.totalorder %s195_s18, %s195_s18 }
  0x2a   :  { %v166_v33 = vld [vmem:[%s414_s2] sm:$0x1]  ;;  %v173_v34 = vsub.s32 0, %v172_v32  ;;  %p304_p2 = scmp.ne.s32.totalorder %s195_s18, %s303_s19  ;;  %p309_p4 = scmp.lt.s32.totalorder %s303_s19, %s303_s19 }
  0x2b   :  { %v212_v38 = vld [vmem:[%s415_s3] ss:$0 sm:$0xff] }
  0x2c   :  { %225 = vmatpush3.bf16.msra.mxu0 %v250_v2  ;;  %p310_p5 = por %p309_p4, %p308_p3 }
  0x2d   :  { %226 = vmatprep.subr.bf16.mxu0 %v335_v0 }
  0x2e   :  { %p311_p6 = pnand %p310_p5, %p304_p2 }
  0x30   :  { %227 = vmatpush3.bf16.msra.mxu0 %v251_v3 }
  0x31   :  { %228 = vmatprep.subr.bf16.mxu0 %v335_v0 }
  0x34   :  { %229 = vmatpush3.bf16.msra.mxu0 %v252_v4 }
  0x35   :  { %230 = vmatprep.subr.bf16.mxu0 %v335_v0 }
  0x38   :  { %231 = vmatpush3.bf16.msra.mxu0 %v253_v5 }
  0x39   :  { %232 = vmatprep.subr.bf16.mxu0 %v335_v0 }
  0x3c   :  { %233 = vmatpush3.bf16.msra.mxu0 %v254_v6 }
  0x3d   :  { %234 = vmatprep.subr.bf16.mxu0 %v335_v0 }
  0x40   :  { %235 = vmatpush3.bf16.msra.mxu0 %v255_v7 }
  0x41   :  { %236 = vmatprep.subr.bf16.mxu0 %v335_v0 }
  0x44   :  { %237 = vmatpush3.bf16.msra.mxu0 %v256_v8 }
  0x47   :  { %239 = vmatmul.mubr.bf16.vlgmr.msra.gmra.mrb[0].mxu0 %v45_v9 }
 0x11a   :  { %v144_v10 = vpop.f32.mrb[0].mxu0 }
 0x11b   :  { %v150_v11 = vrot.slane %v144_v10, 4  ;;  %v240_v12 = vpop.f32.mrb[1].mxu0 }
 0x11c   :  { %v147_v13 = vpop.f32.mrb[2].mxu0 }
 0x11d   :  { %v151_v14 = vadd.f32 %v150_v11, %v144_v10  ;;  %v241_v15 = vpop.f32.mrb[3].mxu0 }
 0x11f   :  { %v152_v16 = vrot.slane %v151_v14, 2 }
 0x121   :  { %v153_v17 = vadd.f32 %v152_v16, %v151_v14 }
 0x123   :  { %v154_v18 = vrot.slane %v153_v17, 1 }
 0x125   :  { %v155_v19 = vadd.f32 %v154_v18, %v153_v17 }
 0x127   :  { %v156_v20 = vmul.f32 0.125, %v155_v19 }
 0x129   :  { %v157_v21 = vsub.f32 %v144_v10, %v156_v20 }
 0x12b   :  { %v158_v22 = vmul.f32 %v157_v21, %v157_v21 }
 0x12d   :  { %v159_v23 = vrot.slane %v158_v22, 4 }
 0x12f   :  { %v160_v24 = vadd.f32 %v159_v23, %v158_v22 }
 0x131   :  { %v161_v25 = vrot.slane %v160_v24, 2 }
 0x133   :  { %v162_v26 = vadd.f32 %v161_v25, %v160_v24 }
 0x135   :  { %v163_v27 = vrot.slane %v162_v26, 1 }
 0x137   :  { %v164_v28 = vadd.f32 %v163_v27, %v162_v26 }
 0x139   :  { %v165_v29 = vmul.f32 0.125, %v164_v28 }
 0x13b   :  { %v167_v30 = vadd.f32 1e-05, %v165_v29 }
 0x13d   :  { %257 = vrsqrt.f32 %v167_v30 }
 0x147   :  { %v258_v35 = vpop.eup %257 }
 0x148   :  { %v169_v36 = vmul.f32 %v258_v35, %v166_v33 }
 0x14a   :  { %v174_v37 = vrot.slane %v169_v36, %v173_v34 }
 0x14c   :  { %v176_v39 = vmul.f32 %v174_v37, %v157_v21 }
 0x14e   :  { %v184_v40 = vadd.f32 %v212_v38, %v176_v39 }
 0x150   :  { %v185_v41 = vmax.f32 %v184_v40, 0.0 }
 0x152   :  { %v186_v42 = vpack.c.bf16 %v185_v41, %v185_v41 }
 0x154   :  { %187 = vst [vmem:[#allocation7] sm:$0xf] %v186_v42 }
 0x155   :  { %314 = shalt.err (!%p311_p6)
}
 0x156   :  { %s315_s21 = scalar_lea.hbm %s416_s4, 64 }
 0x157   :  { %p316_p7 = scmp.ne.s32.totalorder %s416_s4, %s315_s21  ;;  %p319_p8 = scmp.lt.u32.totalorder %s315_s21, %s416_s4 }
 0x159   :  { %p321_p9 = pnand %p319_p8, %p316_p7 }
 0x15b   :  { %324 = shalt.err (!%p321_p9)
}
 0x15c   :  { %197 = dma.vmem_to_hbm [thread:$0]  %s195_s18, 64, %s416_s4, [#allocation4]  }
 0x15d   :  { %329 = dma.done.wait [#allocation4], 64  }
 0x15e   :  { %330 = vsyncadd [#allocation4], 4294967232 }
 0x15f   :  { %201 = vsyncpa [#allocation3], 1 }
 0x160   :  { %202 = vsyncpa [#allocation6], 1 }
 0x161   :  { %203 = vsyncpa [#allocation4], 1 }

</bundles_post_ra>
